<compile_context>
chip_gen: v5e
topology: v5e:2x2
jax: 0.10.0
libtpu: 0.0.40
codegen_flags: <defaults>
</compile_context>

<pallas_src>
import jax
import jax.numpy as jnp
from jax.experimental import pallas as pl
from jax.experimental.pallas import tpu as pltpu


def _round_up(v, m):
    return ((v + m - 1) // m) * m


def dueling_q_kernel(
    x_ref,            # [TB, S]          bf16
    w1_ref, b1_ref,   # [S, H0] bf16,    [1, H0]   ep_dtype
    wh_ref, bh_ref,   # [H0, 2*H1] bf16  (wv1||wa1), [1, 2*H1] ep_dtype
    wo_ref, bo_ref,   # [2*H1, A] bf16   (dueling combine folded in), [1, A] f32
    q_ref,            # out: [TB, A]     f32
):
    # Epilogue dtype (f32 on v5e, bf16 on v6e/v7x) is chosen by the wrapper
    # via the dtype of the hidden-layer biases.
    ep_dtype = b1_ref.dtype

    # Shared trunk: Linear + ReLU  ->  [TB, H0]
    shared = jnp.dot(x_ref[...], w1_ref[...], preferred_element_type=jnp.float32)
    shared = jnp.maximum(shared.astype(ep_dtype) + b1_ref[...], 0.0)

    # Fused value||advantage hidden layer: ONE matmul -> [TB, 2*H1]
    h = jnp.dot(shared.astype(wh_ref.dtype), wh_ref[...],
                preferred_element_type=jnp.float32)
    h = jnp.maximum(h.astype(ep_dtype) + bh_ref[...], 0.0)

    # Output layer with the dueling combine (V + A - mean(A)) already folded
    # into wo/bo -> this single matmul produces Q directly.
    q = jnp.dot(h.astype(wo_ref.dtype), wo_ref[...],
                preferred_element_type=jnp.float32)
    q_ref[...] = q + bo_ref[...]
    # NOTE: A=4 output lanes => masked vst. Only pad the output columns to a
    # lane-dense 128-wide slab if a large-B profile shows stores dominating
    # (it trades output HBM bytes for unmasked stores).


def dueling_q_forward(x, params, *, batch_tile=4096, bf16_epilogue=None):
    """Dueling Q-Network forward pass in one Pallas kernel.

    x: [B, state_dim] float32
    params: dict of weights with PyTorch nn.Linear shapes ([out, in] weights).
    """
    B, S = x.shape
    H0 = params["w1"].shape[0]
    H1 = params["wv1"].shape[0]
    A = params["wa2"].shape[0]

    # bf16 epilogues only where the VALU is bf16-native (v6e / v7x).
    if bf16_epilogue is None:
        try:
            kind = jax.devices()[0].device_kind.lower()
            bf16_epilogue = ("v6" in kind) or ("v7" in kind) or ("trillium" in kind)
        except Exception:
            bf16_epilogue = False
    ep_dtype = jnp.bfloat16 if bf16_epilogue else jnp.float32

    # ---- Fuse / pre-transpose / fold weights in the wrapper (f32 math) ----
    w1 = params["w1"].T.astype(jnp.bfloat16)                       # [S, H0]
    b1 = params["b1"].reshape(1, -1).astype(ep_dtype)              # [1, H0]

    # Hidden layers of both streams: wv1 || wa1  -> [H0, 2*H1]
    wh = jnp.concatenate([params["wv1"].T, params["wa1"].T],
                         axis=1).astype(jnp.bfloat16)              # [H0, 2*H1]
    bh = jnp.concatenate([params["bv1"], params["ba1"]]
                         ).reshape(1, -1).astype(ep_dtype)         # [1, 2*H1]

    # Block-diagonal output layer [2*H1, 1+A], then fold the dueling combine:
    #   Q = out @ M,  M[0,:] = 1,  M[1+i, j] = delta_ij - 1/A   (exact in f32)
    wo_fused = jnp.zeros((2 * H1, 1 + A), jnp.float32)
    wo_fused = wo_fused.at[:H1, 0:1].set(params["wv2"].T.astype(jnp.float32))
    wo_fused = wo_fused.at[H1:, 1:].set(params["wa2"].T.astype(jnp.float32))
    bo_fused = jnp.concatenate([params["bv2"], params["ba2"]]
                               ).reshape(1, -1).astype(jnp.float32)  # [1, 1+A]

    M = jnp.zeros((1 + A, A), jnp.float32)
    M = M.at[0, :].set(1.0)
    M = M.at[1:, :].set(jnp.eye(A, dtype=jnp.float32) - 1.0 / A)

    wo = (wo_fused @ M).astype(jnp.bfloat16)                       # [2*H1, A]
    bo = (bo_fused @ M).astype(jnp.float32)                        # [1, A]

    # ---- Batch tiling ----------------------------------------------------
    # Pad batch to a multiple of 16 (bf16 sublane tile); when possible split
    # into >=2 tiles so the "parallel" grid axis can shard across v7x's two
    # TensorCores.
    B16 = _round_up(B, 16)
    if B16 >= 32:
        TB = min(batch_tile, _round_up(pl.cdiv(B16, 2), 16))
    else:
        TB = B16
    n_tiles = pl.cdiv(B16, TB)
    Bp = n_tiles * TB

    x_in = x.astype(jnp.bfloat16)
    if Bp != B:
        x_in = jnp.pad(x_in, ((0, Bp - B), (0, 0)))

    def x_map(i):
        return (i, 0)

    def const_map(i):
        return (0, 0)

    q_padded = pl.pallas_call(
        dueling_q_kernel,
        out_shape=jax.ShapeDtypeStruct((Bp, A), jnp.float32),
        grid=(n_tiles,),
        in_specs=[
            pl.BlockSpec((TB, S), x_map),          # x: tiled over batch
            pl.BlockSpec(w1.shape, const_map),     # weights/biases resident
            pl.BlockSpec(b1.shape, const_map),
            pl.BlockSpec(wh.shape, const_map),
            pl.BlockSpec(bh.shape, const_map),
            pl.BlockSpec(wo.shape, const_map),
            pl.BlockSpec(bo.shape, const_map),
        ],
        out_specs=pl.BlockSpec((TB, A), x_map),
        compiler_params=pltpu.CompilerParams(
            dimension_semantics=("parallel",),     # shards across v7x TCs
            vmem_limit_bytes=32 * 1024 * 1024,     # covers TB=4096 on v5e too
        ),
    )(x_in, w1, b1, wh, bh, wo, bo)

    return q_padded[:B]


def init_params(key, state_dim, action_dim, hidden_dims=(128, 128)):
    """Deterministic synthetic parameters with PyTorch nn.Linear shapes."""
    h0, h1 = hidden_dims
    keys = jax.random.split(key, 5)

    def lin(k, out_dim, in_dim):
        bound = 1.0 / jnp.sqrt(in_dim)
        kw, kb = jax.random.split(k)
        w = jax.random.uniform(kw, (out_dim, in_dim), jnp.float32, -bound, bound)
        b = jax.random.uniform(kb, (out_dim,), jnp.float32, -bound, bound)
        return w, b

    w1, b1 = lin(keys[0], h0, state_dim)
    wv1, bv1 = lin(keys[1], h1, h0)
    wv2, bv2 = lin(keys[2], 1, h1)
    wa1, ba1 = lin(keys[3], h1, h0)
    wa2, ba2 = lin(keys[4], action_dim, h1)
    return dict(w1=w1, b1=b1, wv1=wv1, bv1=bv1, wv2=wv2, bv2=bv2,
                wa1=wa1, ba1=ba1, wa2=wa2, ba2=ba2)


def reference_forward(x, p):
    """Pure-JAX (f32) reference mirroring the PyTorch forward."""
    shared = jnp.maximum(x @ p["w1"].T + p["b1"], 0.0)
    vh = jnp.maximum(shared @ p["wv1"].T + p["bv1"], 0.0)
    value = vh @ p["wv2"].T + p["bv2"]
    ah = jnp.maximum(shared @ p["wa1"].T + p["ba1"], 0.0)
    adv = ah @ p["wa2"].T + p["ba2"]
    return value + (adv - adv.mean(axis=1, keepdims=True))


if __name__ == "__main__":
    key = jax.random.PRNGKey(0)
    k_params, k_x = jax.random.split(key)

    batch, state_dim, action_dim = 8, 16, 4
    hidden_dims = (128, 128)   # matches the PyTorch module default

    params = init_params(k_params, state_dim, action_dim, hidden_dims)
    x = jax.random.normal(k_x, (batch, state_dim), jnp.float32)

    q = dueling_q_forward(x, params)
    q = jax.block_until_ready(q)

    q_ref = reference_forward(x, params)
    assert q.shape == (batch, action_dim)
    # bf16 matmul operands / folded dueling weights (f32 MXU accumulation)
    # vs a pure-f32 reference.
    assert jnp.allclose(q, q_ref, atol=5e-2, rtol=5e-2), "mismatch vs reference"

    print("KERNEL_OK")
</pallas_src>

<mosaic_0001>
module attributes {stable_mosaic.version = 11 : i64} {
  func.func @dueling_q_kernel(%arg0: i32, %arg1: memref<16x16xbf16, #tpu.memory_space<vmem>>, %arg2: memref<16x128xbf16, #tpu.memory_space<vmem>>, %arg3: memref<1x128xf32, #tpu.memory_space<vmem>>, %arg4: memref<128x256xbf16, #tpu.memory_space<vmem>>, %arg5: memref<1x256xf32, #tpu.memory_space<vmem>>, %arg6: memref<256x4xbf16, #tpu.memory_space<vmem>>, %arg7: memref<1x4xf32, #tpu.memory_space<vmem>>, %arg8: memref<16x4xf32, #tpu.memory_space<vmem>>) attributes {dimension_semantics = [#tpu.dimension_semantics<parallel>], iteration_bounds = array<i64: 1>, scalar_prefetch = 0 : i64, scratch_operands = 0 : i64, tpu.core_type = #tpu.core_type<tc>, window_params = [{transform_indices = @transform_0, window_bounds = array<i64: 16, 16>}, {pipeline_mode = #tpu.pipeline_mode<synchronous>, transform_indices = @transform_1, window_bounds = array<i64: 16, 128>}, {pipeline_mode = #tpu.pipeline_mode<synchronous>, transform_indices = @transform_2, window_bounds = array<i64: 1, 128>}, {pipeline_mode = #tpu.pipeline_mode<synchronous>, transform_indices = @transform_3, window_bounds = array<i64: 128, 256>}, {pipeline_mode = #tpu.pipeline_mode<synchronous>, transform_indices = @transform_4, window_bounds = array<i64: 1, 256>}, {pipeline_mode = #tpu.pipeline_mode<synchronous>, transform_indices = @transform_5, window_bounds = array<i64: 256, 4>}, {pipeline_mode = #tpu.pipeline_mode<synchronous>, transform_indices = @transform_6, window_bounds = array<i64: 1, 4>}, {transform_indices = @transform_7, window_bounds = array<i64: 16, 4>}]} {
    %c0 = arith.constant 0 : index
    %c0_0 = arith.constant 0 : index
    %0 = vector.load %arg1[%c0, %c0_0] : memref<16x16xbf16, #tpu.memory_space<vmem>>, vector<16x16xbf16>
    %c0_1 = arith.constant 0 : index
    %c0_2 = arith.constant 0 : index
    %1 = vector.load %arg2[%c0_1, %c0_2] : memref<16x128xbf16, #tpu.memory_space<vmem>>, vector<16x128xbf16>
    %cst = arith.constant dense<0.000000e+00> : vector<16x128xf32>
    %2 = tpu.matmul %0, %1, %cst {dimension_numbers = #tpu.dot_dimension_numbers<[1], [0], [0], [1], [0, 0, 1, 1], [], []>} : vector<16x16xbf16>, vector<16x128xbf16>, vector<16x128xf32> -> vector<16x128xf32>
    %c0_3 = arith.constant 0 : index
    %c0_4 = arith.constant 0 : index
    %3 = vector.load %arg3[%c0_3, %c0_4] : memref<1x128xf32, #tpu.memory_space<vmem>>, vector<1x128xf32>
    %4 = vector.broadcast %3 : vector<1x128xf32> to vector<16x128xf32>
    %5 = arith.addf %2, %4 : vector<16x128xf32>
    %cst_5 = arith.constant 0.000000e+00 : f32
    %6 = vector.broadcast %cst_5 : f32 to vector<16x128xf32>
    %7 = arith.maximumf %5, %6 : vector<16x128xf32>
    %8 = arith.truncf %7 : vector<16x128xf32> to vector<16x128xbf16>
    %c0_6 = arith.constant 0 : index
    %c0_7 = arith.constant 0 : index
    %9 = vector.load %arg4[%c0_6, %c0_7] : memref<128x256xbf16, #tpu.memory_space<vmem>>, vector<128x256xbf16>
    %cst_8 = arith.constant dense<0.000000e+00> : vector<16x256xf32>
    %10 = tpu.matmul %8, %9, %cst_8 {dimension_numbers = #tpu.dot_dimension_numbers<[1], [0], [0], [1], [0, 0, 1, 1], [], []>} : vector<16x128xbf16>, vector<128x256xbf16>, vector<16x256xf32> -> vector<16x256xf32>
    %c0_9 = arith.constant 0 : index
    %c0_10 = arith.constant 0 : index
    %11 = vector.load %arg5[%c0_9, %c0_10] : memref<1x256xf32, #tpu.memory_space<vmem>>, vector<1x256xf32>
    %12 = vector.broadcast %11 : vector<1x256xf32> to vector<16x256xf32>
    %13 = arith.addf %10, %12 : vector<16x256xf32>
    %cst_11 = arith.constant 0.000000e+00 : f32
    %14 = vector.broadcast %cst_11 : f32 to vector<16x256xf32>
    %15 = arith.maximumf %13, %14 : vector<16x256xf32>
    %16 = arith.truncf %15 : vector<16x256xf32> to vector<16x256xbf16>
    %c0_12 = arith.constant 0 : index
    %c0_13 = arith.constant 0 : index
    %17 = vector.load %arg6[%c0_12, %c0_13] : memref<256x4xbf16, #tpu.memory_space<vmem>>, vector<256x4xbf16>
    %cst_14 = arith.constant dense<0.000000e+00> : vector<16x4xf32>
    %18 = tpu.matmul %16, %17, %cst_14 {dimension_numbers = #tpu.dot_dimension_numbers<[1], [0], [0], [1], [0, 0, 1, 1], [], []>} : vector<16x256xbf16>, vector<256x4xbf16>, vector<16x4xf32> -> vector<16x4xf32>
    %c0_15 = arith.constant 0 : index
    %c0_16 = arith.constant 0 : index
    %19 = vector.load %arg7[%c0_15, %c0_16] : memref<1x4xf32, #tpu.memory_space<vmem>>, vector<1x4xf32>
    %20 = vector.broadcast %19 : vector<1x4xf32> to vector<16x4xf32>
    %21 = arith.addf %18, %20 : vector<16x4xf32>
    %c0_17 = arith.constant 0 : index
    %c0_18 = arith.constant 0 : index
    %22 = vector.load %arg8[%c0_17, %c0_18] : memref<16x4xf32, #tpu.memory_space<vmem>>, vector<16x4xf32>
    tpu.vector_store %arg8[%c0_17, %c0_18], %21 {strides = array<i32>} : memref<16x4xf32, #tpu.memory_space<vmem>>, vector<16x4xf32>,
    return
  }
  func.func @transform_0(%arg0: i32) -> (i32, i32) {
    %c0_i32 = arith.constant 0 : i32
    %c0_i32_0 = arith.constant 0 : i32
    return %arg0, %c0_i32 : i32, i32
  }
  func.func @transform_1(%arg0: i32) -> (i32, i32) {
    %c0_i32 = arith.constant 0 : i32
    %c0_i32_0 = arith.constant 0 : i32
    %c0_i32_1 = arith.constant 0 : i32
    return %c0_i32, %c0_i32_0 : i32, i32
  }
  func.func @transform_2(%arg0: i32) -> (i32, i32) {
    %c0_i32 = arith.constant 0 : i32
    %c0_i32_0 = arith.constant 0 : i32
    %c0_i32_1 = arith.constant 0 : i32
    return %c0_i32, %c0_i32_0 : i32, i32
  }
  func.func @transform_3(%arg0: i32) -> (i32, i32) {
    %c0_i32 = arith.constant 0 : i32
    %c0_i32_0 = arith.constant 0 : i32
    %c0_i32_1 = arith.constant 0 : i32
    return %c0_i32, %c0_i32_0 : i32, i32
  }
  func.func @transform_4(%arg0: i32) -> (i32, i32) {
    %c0_i32 = arith.constant 0 : i32
    %c0_i32_0 = arith.constant 0 : i32
    %c0_i32_1 = arith.constant 0 : i32
    return %c0_i32, %c0_i32_0 : i32, i32
  }
  func.func @transform_5(%arg0: i32) -> (i32, i32) {
    %c0_i32 = arith.constant 0 : i32
    %c0_i32_0 = arith.constant 0 : i32
    %c0_i32_1 = arith.constant 0 : i32
    return %c0_i32, %c0_i32_0 : i32, i32
  }
  func.func @transform_6(%arg0: i32) -> (i32, i32) {
    %c0_i32 = arith.constant 0 : i32
    %c0_i32_0 = arith.constant 0 : i32
    %c0_i32_1 = arith.constant 0 : i32
    return %c0_i32, %c0_i32_0 : i32, i32
  }
  func.func @transform_7(%arg0: i32) -> (i32, i32) {
    %c0_i32 = arith.constant 0 : i32
    %c0_i32_0 = arith.constant 0 : i32
    return %arg0, %c0_i32 : i32, i32
  }
}

</mosaic_0001>

<bundles_post_ra>
// kernel: tpu_custom_call.1
= control target key start
LH: loop header
LB: loop body
LE: loop exit
PB: predicated region body
PF: predicated region fallthrough
CT: control target
= control target key end

     0   :  { %12 = vsyncpa [#allocation3], 0  ;;  %s843_s0 = inlined_call_operand.hbm [shape: bf16[16,16], index: 0, kind: input, shape index: {}]   ;;  %s844_s1 = inlined_call_operand.hbm [shape: bf16[16,128], index: 1, kind: input, shape index: {}]   ;;  %s845_s2 = inlined_call_operand.vmem [shape: f32[1,128], index: 2, kind: input, shape index: {}]   ;;  %s846_s3 = inlined_call_operand.vmem [shape: bf16[128,256], index: 3, kind: input, shape index: {}]   ;;  %s847_s4 = inlined_call_operand.vmem [shape: f32[1,256], index: 4, kind: input, shape index: {}]   ;;  %s848_s5 = inlined_call_operand.vmem [shape: bf16[256,4], index: 5, kind: input, shape index: {}]   ;;  %s849_s6 = inlined_call_operand.vmem [shape: f32[1,4], index: 6, kind: input, shape index: {}]   ;;  %s850_s7 = inlined_call_operand.vmem [shape: f32[16,4], index: 7, kind: output, shape index: {}]  }
   0x1   :  { %s18_s26 = sshll.u32 %s843_s0, 4  ;;  %s19_s26 = int_to_ptr.hbm [resolvable:$true] %s18_s26 }
   0x2   :  { %13 = vsyncpa [#allocation5], 0  ;;  %s633_s27 = smov [#allocation2]   ;;  %s31_s8 = sshll.u32 %s844_s1, 4  ;;  %s32_s8 = int_to_ptr.hbm [resolvable:$true] %s31_s8 }
   0x3   :  { %s20_s28 = sshll.u32 %s633_s27, 4  ;;  %s634_s9 = smov 64   ;;  %s21_s28 = int_to_ptr.vmem [resolvable:$true] %s20_s28 }
   0x4   :  { %s635_s10 = smov 4   ;;  %s636_s11 = smov [#allocation4]  }
   0x5   :  { %26 = dma.hbm_to_vmem [thread:$0]  %s19_s26, 128, %s21_s28, [#allocation3], %s634_s9, %s634_s9, %s635_s10  }
   0x6   :  { %s33_s12 = sshll.u32 %s636_s11, 4  ;;  %s34_s12 = int_to_ptr.vmem [resolvable:$true] %s33_s12 }
   0x7   :  { %39 = dma.hbm_to_vmem [thread:$0]  %s32_s8, 128, %s34_s12, [#allocation5], %s634_s9, %s634_s9, %s635_s10  }
   0x8   :  { %629 = dma.done.wait [#allocation3], 128  }
   0x9   :  { %630 = vsyncadd [#allocation3], 4294967168 }
   0xa   :  { %631 = dma.done.wait [#allocation5], 128  }
   0xb   :  { %632 = vsyncadd [#allocation5], 4294967168  ;;  %v542_v0 = vld [vmem:[#allocation4] sm:$0xff]  ;;  %v541_v1 = vld [vmem:[#allocation2] sm:$0xff]  ;;  %vm78_vm0 = vcmask 130048   ;;  %vm395_vm1 = vcmask 31744  }
   0xc   :  { %v471_v2 = vld [vmem:[%s846_s3 + $0x70] sm:$0xf]  ;;  %v558_v3 = vld [vmem:[%s846_s3 + $0x74] sm:$0xf0]  ;;  %v557_v4 = vld [vmem:[%s846_s3 + $0x74] sm:$0xf]  ;;  %89 = vmatpush.bf16.msra.mxu0 %v542_v0 }
   0xd   :  { %v473_v5 = vld [vmem:[%s846_s3 + $0x78] sm:$0xf0]  ;;  %v472_v6 = vor.u32 %v558_v3, %v471_v2  ;;  %v463_v8 = vld [vmem:[%s846_s3 + $0x60] sm:$0xf]  ;;  %v556_v9 = vld [vmem:[%s846_s3 + $0x64] sm:$0xf0] }
   0xe   :  { %v476_v7 = vor.u32 %v557_v4, %v473_v5  ;;  %v555_v10 = vld [vmem:[%s846_s3 + $0x64] sm:$0xf]  ;;  %v465_v11 = vld [vmem:[%s846_s3 + $0x68] sm:$0xf0]  ;;  %v464_v12 = vor.u32 %v556_v9, %v463_v8  ;;  %v455_v14 = vld [vmem:[%s846_s3 + $0x50] sm:$0xf] }
   0xf   :  { %201 = vmatpush.bf16.msra.mxu1 %v472_v6  ;;  %v468_v13 = vor.u32 %v555_v10, %v465_v11  ;;  %412 = vmatmul.msk.bf16.vlgmr.msra.gmra.mxu0 %vm78_vm0, %v541_v1  ;;  %v554_v15 = vld [vmem:[%s846_s3 + $0x54] sm:$0xf0]  ;;  %v553_v16 = vld [vmem:[%s846_s3 + $0x54] sm:$0xf]  ;;  %v457_v17 = vld [vmem:[%s846_s3 + $0x58] sm:$0xf0] }
  0x10   :  { %215 = vmatpush.bf16.msra.mxu2 %v476_v7  ;;  %v456_v18 = vor.u32 %v554_v15, %v455_v14  ;;  %v460_v19 = vor.u32 %v553_v16, %v457_v17  ;;  %v447_v20 = vld [vmem:[%s846_s3 + $0x40] sm:$0xf]  ;;  %v552_v21 = vld [vmem:[%s846_s3 + $0x44] sm:$0xf0]  ;;  %v551_v22 = vld [vmem:[%s846_s3 + $0x44] sm:$0xf] }
  0x11   :  { %v449_v23 = vld [vmem:[%s846_s3 + $0x48] sm:$0xf0]  ;;  %v448_v24 = vor.u32 %v552_v21, %v447_v20  ;;  %v439_v26 = vld [vmem:[%s846_s3 + $0x30] sm:$0xf]  ;;  %v550_v27 = vld [vmem:[%s846_s3 + $0x34] sm:$0xf0] }
  0x12   :  { %v452_v25 = vor.u32 %v551_v22, %v449_v23  ;;  %v549_v28 = vld [vmem:[%s846_s3 + $0x34] sm:$0xf]  ;;  %v440_v29 = vor.u32 %v550_v27, %v439_v26  ;;  %v441_v30 = vld [vmem:[%s846_s3 + $0x38] sm:$0xf0]  ;;  %v431_v32 = vld [vmem:[%s846_s3 + $0x20] sm:$0xf] }
  0x13   :  { %202 = vmatpush.bf16.msra.mxu1 %v464_v12  ;;  %v444_v31 = vor.u32 %v549_v28, %v441_v30  ;;  %v548_v33 = vld [vmem:[%s846_s3 + $0x24] sm:$0xf0]  ;;  %v547_v34 = vld [vmem:[%s846_s3 + $0x24] sm:$0xf]  ;;  %v433_v36 = vld [vmem:[%s846_s3 + $0x28] sm:$0xf0] }
  0x14   :  { %216 = vmatpush.bf16.msra.mxu2 %v468_v13  ;;  %v432_v35 = vor.u32 %v548_v33, %v431_v32  ;;  %v436_v37 = vor.u32 %v547_v34, %v433_v36  ;;  %v423_v38 = vld [vmem:[%s846_s3 + $0x10] sm:$0xf]  ;;  %v546_v39 = vld [vmem:[%s846_s3 + $0x14] sm:$0xf0]  ;;  %v545_v40 = vld [vmem:[%s846_s3 + $0x14] sm:$0xf] }
  0x15   :  { %v424_v41 = vor.u32 %v546_v39, %v423_v38  ;;  %v425_v42 = vld [vmem:[%s846_s3 + $0x18] sm:$0xf0]  ;;  %v415_v44 = vld [vmem:[%s846_s3] sm:$0xf]  ;;  %v544_v45 = vld [vmem:[%s846_s3 + $0x4] sm:$0xf0] }
  0x16   :  { %v428_v43 = vor.u32 %v545_v40, %v425_v42  ;;  %v543_v46 = vld [vmem:[%s846_s3 + $0x4] sm:$0xf]  ;;  %v416_v47 = vor.u32 %v544_v45, %v415_v44  ;;  %v417_v48 = vld [vmem:[%s846_s3 + $0x8] sm:$0xf0]  ;;  %v566_v50 = vld [vmem:[%s848_s5 + $0x38] sm:$0xff] }
  0x17   :  { %203 = vmatpush.bf16.msra.mxu1 %v456_v18  ;;  %v420_v49 = vor.u32 %v543_v46, %v417_v48  ;;  %v574_v51 = vld [vmem:[%s848_s5 + $0x78] sm:$0xff]  ;;  %367 = vmatpush.bf16.msra.mxu3 %v566_v50  ;;  %v565_v52 = vld [vmem:[%s848_s5 + $0x30] sm:$0xff]  ;;  %v564_v54 = vld [vmem:[%s848_s5 + $0x28] sm:$0xff] }
  0x18   :  { %217 = vmatpush.bf16.msra.mxu2 %v460_v19  ;;  %381 = vmatpush.bf16.msrb.mxu0 %v574_v51  ;;  %v573_v53 = vld [vmem:[%s848_s5 + $0x70] sm:$0xff]  ;;  %v572_v55 = vld [vmem:[%s848_s5 + $0x68] sm:$0xff]  ;;  %v563_v56 = vld [vmem:[%s848_s5 + $0x20] sm:$0xff] }
  0x19   :  { %v579_v58 = vld [vmem:[%s845_s2] ss:$0 sm:$0xff]  ;;  %v562_v1 = vld [vmem:[%s848_s5 + $0x18] sm:$0xff]  ;;  %v561_v3 = vld [vmem:[%s848_s5 + $0x10] sm:$0xff] }
  0x1a   :  { %v571_v2 = vld [vmem:[%s848_s5 + $0x60] sm:$0xff]  ;;  %v570_v4 = vld [vmem:[%s848_s5 + $0x58] sm:$0xff]  ;;  %v560_v5 = vld [vmem:[%s848_s5 + $0x8] sm:$0xff] }
  0x1b   :  { %204 = vmatpush.bf16.msra.mxu1 %v448_v24  ;;  %368 = vmatpush.bf16.msra.mxu3 %v565_v52  ;;  %v569_v6 = vld [vmem:[%s848_s5 + $0x50] sm:$0xff]  ;;  %v559_v7 = vld [vmem:[%s848_s5] sm:$0xff]  ;;  %v568_v8 = vld [vmem:[%s848_s5 + $0x48] sm:$0xff] }
  0x1c   :  { %218 = vmatpush.bf16.msra.mxu2 %v452_v25  ;;  %382 = vmatpush.bf16.msrb.mxu0 %v573_v53  ;;  %v567_v9 = vld [vmem:[%s848_s5 + $0x40] sm:$0xff] }
  0x1d   :  { %v115_v10 = vld [vmem:[%s847_s4] sm:$0x3] }
  0x1e   :  { %v117_v12 = vperm.slane %v115_v10, 0  ;;  %v118_v16 = vperm.slane %v115_v10, 1  ;;  %v580_v27 = vld [vmem:[%s849_s6] ss:$0 sm:$0xff] }
  0x1f   :  { %205 = vmatpush.bf16.msra.mxu1 %v440_v29  ;;  %369 = vmatpush.bf16.msra.mxu3 %v564_v54 }
  0x20   :  { %219 = vmatpush.bf16.msra.mxu2 %v444_v31  ;;  %383 = vmatpush.bf16.msrb.mxu0 %v572_v55 }
  0x23   :  { %206 = vmatpush.bf16.msra.mxu1 %v432_v35  ;;  %370 = vmatpush.bf16.msra.mxu3 %v563_v56 }
  0x24   :  { %220 = vmatpush.bf16.msra.mxu2 %v436_v37  ;;  %384 = vmatpush.bf16.msrb.mxu0 %v571_v2 }
  0x27   :  { %207 = vmatpush.bf16.msra.mxu1 %v424_v41  ;;  %371 = vmatpush.bf16.msra.mxu3 %v562_v1 }
  0x28   :  { %221 = vmatpush.bf16.msra.mxu2 %v428_v43  ;;  %385 = vmatpush.bf16.msrb.mxu0 %v570_v4 }
  0x2b   :  { %208 = vmatpush.bf16.msra.mxu1 %v416_v47  ;;  %372 = vmatpush.bf16.msra.mxu3 %v561_v3 }
  0x2c   :  { %222 = vmatpush.bf16.msra.mxu2 %v420_v49  ;;  %386 = vmatpush.bf16.msrb.mxu0 %v569_v6 }
  0x2f   :  { %373 = vmatpush.bf16.msra.mxu3 %v560_v5 }
  0x30   :  { %387 = vmatpush.bf16.msrb.mxu0 %v568_v8 }
  0x33   :  { %374 = vmatpush.bf16.msra.mxu3 %v559_v7 }
  0x34   :  { %388 = vmatpush.bf16.msrb.mxu0 %v567_v9 }
  0x8c   :  { %v91_v57 = vpop.f32.mrf.mxu0 }
  0x8d   :  { %v92_v59 = vadd.f32 %v579_v58, %v91_v57 }
  0x8f   :  { %v96_v62 = vmax.f32 %v92_v59, 0.0 }
  0x94   :  { %v93_v60 = vpop.f32.mrf.mxu0 }
  0x95   :  { %v94_v61 = vadd.f32 %v579_v58, %v93_v60 }
  0x97   :  { %v97_v63 = vmax.f32 %v94_v61, 0.0 }
  0x99   :  { %v98_v0 = vpack.c.bf16 %v97_v63, %v96_v62 }
  0x9b   :  { %209 = vmatmul.bf16.vlgmr.msra.gmra.mxu1 %v98_v0  ;;  %223 = vmatmul.bf16.vlgmr.msra.gmra.mxu2 %v98_v0 }
 0x118   :  { %v210_v11 = vpop.f32.mrf.mxu1 }
 0x119   :  { %v211_v14 = vadd.f32 %v210_v11, %v117_v12 }
 0x11b   :  { %v229_v18 = vmax.f32 %v211_v14, 0.0 }
 0x11e   :  { %v224_v13 = vpop.f32.mrf.mxu2 }
 0x11f   :  { %v225_v20 = vadd.f32 %v224_v13, %v118_v16 }
 0x120   :  { %v212_v15 = vpop.f32.mrf.mxu1 }
 0x121   :  { %v213_v17 = vadd.f32 %v212_v15, %v117_v12  ;;  %v230_v24 = vmax.f32 %v225_v20, 0.0 }
 0x123   :  { %v231_v19 = vmax.f32 %v213_v17, 0.0 }
 0x125   :  { %v233_v21 = vpack.c.bf16 %v231_v19, %v229_v18 }
 0x126   :  { %v226_v22 = vpop.f32.mrf.mxu2 }
 0x127   :  { %v227_v23 = vadd.f32 %v226_v22, %v118_v16  ;;  %375 = vmatmul.bf16.vlgmr.msra.gmra.mxu3 %v233_v21 }
 0x129   :  { %v232_v25 = vmax.f32 %v227_v23, 0.0 }
 0x12b   :  { %v234_v26 = vpack.c.bf16 %v232_v25, %v230_v24 }
 0x12d   :  { %389 = vmatmul.bf16.vlgmr.msrb.gmra.mxu0 %v234_v26 }
 0x1aa   :  { %v376_v28 = vpop.f32.mrf.mxu3  ;;  %v390_v29 = vpop.f32.mrf.mxu0 }
 0x1ab   :  { %v377_v30 = vadd.f32 %v580_v27, %v376_v28 }
 0x1ad   :  { %v391_v31 = vadd.f32 %v390_v29, %v377_v30 }
 0x1af   :  { %396 = vst.msk [vmem:[%s850_s7] sm:$0xff] %vm395_vm1, %v391_v31 }
 0x1b2   :  { %v378_v32 = vpop.f32.mrf.mxu3  ;;  %v392_v34 = vpop.f32.mrf.mxu0 }
 0x1b3   :  { %v379_v33 = vadd.f32 %v580_v27, %v378_v32 }
 0x1b5   :  { %v393_v35 = vadd.f32 %v392_v34, %v379_v33 }
 0x1b7   :  { %397 = vst.msk [vmem:[%s850_s7 + $0x8] sm:$0xff] %vm395_vm1, %v393_v35 }
 0x1b8   :  { %402 = vsyncpa [#allocation3], 1 }
 0x1b9   :  { %403 = vsyncpa [#allocation5], 1 }

</bundles_post_ra>
